<compile_context>
chip_gen: v7x
topology: tpu7x:2x2x1
jax: 0.10.0
libtpu: 0.0.40
codegen_flags: <defaults>
</compile_context>

<pallas_src>
import jax
import jax.numpy as jnp
from jax import lax
from jax.experimental import pallas as pl
from jax.experimental.pallas import tpu as pltpu

_NT_DIMS = (((1,), (1,)), ((), ()))   # contract the last dim of both operands


def _mlp_kernel(x_ref, w1_ref, b1_ref, w2_ref, b2_ref, o_ref):
    # x_ref : [tb, 3]   native row-major batch block
    # w1_ref: [h, 3]    fc1.weight (VMEM-resident, constant index_map)
    # b1_ref: [h, 1]    fc1.bias
    # w2_ref: [h, 1]    fc2.weight, transposed
    # b2_ref: [1, 1]    fc2.bias, scalar in SMEM
    # o_ref : [1, tb]   lane-dense output block
    tb = x_ref.shape[0]
    h = w1_ref.shape[0]

    # Largest lane-chunk that divides the batch tile (bounds the per-chunk live
    # vreg set instead of materializing an [h, tb] intermediate).
    if tb % 256 == 0:
        chunk = 256
    elif tb % 128 == 0:
        chunk = 128
    else:
        chunk = tb

    w1 = w1_ref[...]                                              # [h, 3]
    # Hoisted lane-broadcasts (built once per grid step, reused by every chunk).
    b1b = jnp.broadcast_to(b1_ref[...], (h, chunk))               # [h, chunk]
    w2b = jnp.broadcast_to(w2_ref[...], (h, chunk))               # [h, chunk]
    b2 = b2_ref[0, 0]

    # Static (fully unrolled) loop over lane chunks of the batch tile.
    for start in range(0, tb, chunk):
        x_c = x_ref[pl.ds(start, chunk), :].astype(jnp.float32)   # [chunk, 3]
        # fc1 + sublane->lane relayout in one NT dot:
        #   hid[j, b] = sum_k w1[j, k] * x_c[b, k]
        hid = lax.dot_general(w1, x_c, _NT_DIMS,
                              precision=lax.Precision.HIGHEST,
                              preferred_element_type=jnp.float32)  # [h, chunk]
        hid = jnp.maximum(hid + b1b, 0.0)
        # fc2 (output width 1): VPU multiply + sublane reduction + SMEM scalar bias.
        y = jnp.sum(w2b * hid, axis=0, keepdims=True) + b2         # [1, chunk]
        o_ref[:, pl.ds(start, chunk)] = y.astype(o_ref.dtype)


def price_prediction_ann(x, w1, b1, w2, b2, *, block_b=8192):
    """Forward pass of PricePredictionANN.

    x : [B, 3]  float32 or bfloat16
    w1: [h, 3]  fc1.weight     b1: [h]  fc1.bias
    w2: [1, h]  fc2.weight     b2: [1]  fc2.bias
    returns [B, 1] float32
    """
    B, f = x.shape
    assert f == 3, "PricePredictionANN expects 3 input features"
    h = w1.shape[0]

    # Batch-tile selection:
    #  * single exact block for tiny batches,
    #  * otherwise a multiple of 128 with >= 2 grid steps (uses both v7x TCs),
    #  * capped at block_b (default 8192) so the lane-padded (tb, 3) block plus
    #    double buffering stays well inside v7x's 64 MiB VMEM.
    if B <= 128:
        tb = B
    else:
        half = -(-B // 2)                                   # ceil(B / 2)
        tb = min(block_b, ((half + 127) // 128) * 128)
    grid = (pl.cdiv(B, tb),)

    # Tiny one-time parameter relayouts (negligible; the big array x is untouched).
    w1c = w1.astype(jnp.float32)                  # [h, 3]
    b1c = b1.reshape(h, 1).astype(jnp.float32)    # [h, 1]
    w2c = w2.reshape(h, 1).astype(jnp.float32)    # [h, 1]  (fc2.weight is [1, h])
    b2c = b2.reshape(1, 1).astype(jnp.float32)    # [1, 1]  scalar via SMEM

    out = pl.pallas_call(
        _mlp_kernel,
        out_shape=jax.ShapeDtypeStruct((1, B), jnp.float32),
        grid=grid,
        in_specs=[
            pl.BlockSpec((tb, 3), lambda i: (i, 0)),        # x: pipelined batch blocks
            pl.BlockSpec((h, 3), lambda i: (0, 0)),         # weights stay VMEM-resident
            pl.BlockSpec((h, 1), lambda i: (0, 0)),
            pl.BlockSpec((h, 1), lambda i: (0, 0)),
            pl.BlockSpec(memory_space=pltpu.MemorySpace.SMEM),   # scalar b2
        ],
        out_specs=pl.BlockSpec((1, tb), lambda i: (0, i)),
        compiler_params=pltpu.CompilerParams(
            dimension_semantics=("parallel",),
            vmem_limit_bytes=32 * 1024 * 1024),
    )(x, w1c, b1c, w2c, b2c)

    # (1, B) row-major is bit-identical to (B, 1): free reshape, no slice/copy.
    return out.reshape(B, 1)


def _reference(x, w1, b1, w2, b2):
    hp = jnp.dot(x.astype(jnp.float32), w1.T, precision=lax.Precision.HIGHEST)
    hid = jnp.maximum(hp + b1[None, :], 0.0)
    return jnp.dot(hid, w2.T, precision=lax.Precision.HIGHEST) + b2[None, :]


if __name__ == "__main__":
    key = jax.random.PRNGKey(0)
    kx, k1, k2, k3, k4, kx2 = jax.random.split(key, 6)

    hidden = 32
    # Parameters in PyTorch nn.Linear shapes.
    w1 = jax.random.uniform(k1, (hidden, 3), jnp.float32, -0.5, 0.5)   # fc1.weight
    b1 = jax.random.uniform(k2, (hidden,), jnp.float32, -0.5, 0.5)     # fc1.bias
    w2 = jax.random.uniform(k3, (1, hidden), jnp.float32, -0.5, 0.5)   # fc2.weight
    b2 = jax.random.uniform(k4, (1,), jnp.float32, -0.5, 0.5)          # fc2.bias

    # Small batch (single exact block).
    x_small = jax.random.normal(kx, (8, 3), jnp.float32)
    out_small = jax.block_until_ready(price_prediction_ann(x_small, w1, b1, w2, b2))
    ref_small = _reference(x_small, w1, b1, w2, b2)
    assert out_small.shape == (8, 1)
    assert jnp.allclose(out_small, ref_small, atol=1e-4, rtol=1e-4)

    # Larger batch exercising multi-block pipelining, the lane-chunk loop and a
    # partial (ragged) final block.
    x_big = jax.random.normal(kx2, (1000, 3), jnp.float32)
    out_big = jax.block_until_ready(price_prediction_ann(x_big, w1, b1, w2, b2))
    ref_big = _reference(x_big, w1, b1, w2, b2)
    assert out_big.shape == (1000, 1)
    assert jnp.allclose(out_big, ref_big, atol=1e-4, rtol=1e-4)

    print("KERNEL_OK")
</pallas_src>

<mosaic_0001>
module attributes {stable_mosaic.version = 11 : i64} {
  func.func @_mlp_kernel(%arg0: i32, %arg1: memref<8x3xf32, #tpu.memory_space<vmem>>, %arg2: memref<32x3xf32, #tpu.memory_space<vmem>>, %arg3: memref<32x1xf32, #tpu.memory_space<vmem>>, %arg4: memref<32x1xf32, #tpu.memory_space<vmem>>, %arg5: memref<1x1xf32, #tpu.memory_space<smem>>, %arg6: memref<1x8xf32, #tpu.memory_space<vmem>>) attributes {dimension_semantics = [#tpu.dimension_semantics<parallel>], iteration_bounds = array<i64: 1>, scalar_prefetch = 0 : i64, scratch_operands = 0 : i64, tpu.core_type = #tpu.core_type<tc>, window_params = [{transform_indices = @transform_0, window_bounds = array<i64: 8, 3>}, {pipeline_mode = #tpu.pipeline_mode<synchronous>, transform_indices = @transform_1, window_bounds = array<i64: 32, 3>}, {pipeline_mode = #tpu.pipeline_mode<synchronous>, transform_indices = @transform_2, window_bounds = array<i64: 32, 1>}, {pipeline_mode = #tpu.pipeline_mode<synchronous>, transform_indices = @transform_3, window_bounds = array<i64: 32, 1>}, {transform_indices = @transform_4, window_bounds = array<i64: 1, 1>}, {transform_indices = @transform_5, window_bounds = array<i64: 1, 8>}]} {
    %c0 = arith.constant 0 : index
    %c0_0 = arith.constant 0 : index
    %0 = vector.load %arg2[%c0, %c0_0] : memref<32x3xf32, #tpu.memory_space<vmem>>, vector<32x3xf32>
    %c0_1 = arith.constant 0 : index
    %c0_2 = arith.constant 0 : index
    %1 = vector.load %arg3[%c0_1, %c0_2] : memref<32x1xf32, #tpu.memory_space<vmem>>, vector<32x1xf32>
    %2 = vector.shape_cast %1 : vector<32x1xf32> to vector<32x1xf32>
    %3 = vector.broadcast %2 : vector<32x1xf32> to vector<32x8xf32>
    %c0_3 = arith.constant 0 : index
    %c0_4 = arith.constant 0 : index
    %4 = vector.load %arg4[%c0_3, %c0_4] : memref<32x1xf32, #tpu.memory_space<vmem>>, vector<32x1xf32>
    %5 = vector.shape_cast %4 : vector<32x1xf32> to vector<32x1xf32>
    %6 = vector.broadcast %5 : vector<32x1xf32> to vector<32x8xf32>
    %c0_5 = arith.constant 0 : index
    %c0_6 = arith.constant 0 : index
    %7 = memref.load %arg5[%c0_5, %c0_6] : memref<1x1xf32, #tpu.memory_space<smem>>
    %c0_7 = arith.constant 0 : index
    %c0_8 = arith.constant 0 : index
    %8 = vector.load %arg1[%c0_7, %c0_8] : memref<8x3xf32, #tpu.memory_space<vmem>>, vector<8x3xf32>
    %cst = arith.constant dense<0.000000e+00> : vector<32x8xf32>
    %9 = tpu.matmul %0, %8, %cst {dimension_numbers = #tpu.dot_dimension_numbers<[1], [1], [0], [0], [0, 0, 1, 0], [], []>, precision = #tpu.contract_precision<fp32>} : vector<32x3xf32>, vector<8x3xf32>, vector<32x8xf32> -> vector<32x8xf32>
    %10 = arith.addf %9, %3 : vector<32x8xf32>
    %cst_9 = arith.constant 0.000000e+00 : f32
    %11 = vector.broadcast %cst_9 : f32 to vector<32x8xf32>
    %12 = arith.maximumf %10, %11 : vector<32x8xf32>
    %13 = arith.mulf %6, %12 : vector<32x8xf32>
    %cst_10 = arith.constant dense<0.000000e+00> : vector<8xf32>
    %14 = vector.multi_reduction <add>, %13, %cst_10 [0] : vector<32x8xf32> to vector<8xf32>
    %15 = vector.shape_cast %14 : vector<8xf32> to vector<1x8xf32>
    %16 = vector.broadcast %7 : f32 to vector<1x8xf32>
    %17 = arith.addf %15, %16 : vector<1x8xf32>
    %c0_11 = arith.constant 0 : index
    %c0_12 = arith.constant 0 : index
    %18 = vector.load %arg6[%c0_11, %c0_12] : memref<1x8xf32, #tpu.memory_space<vmem>>, vector<1x8xf32>
    tpu.vector_store %arg6[%c0_11, %c0_12], %17 {strides = array<i32>} : memref<1x8xf32, #tpu.memory_space<vmem>>, vector<1x8xf32>,
    return
  }
  func.func @transform_0(%arg0: i32) -> (i32, i32) {
    %c0_i32 = arith.constant 0 : i32
    %c0_i32_0 = arith.constant 0 : i32
    return %arg0, %c0_i32 : i32, i32
  }
  func.func @transform_1(%arg0: i32) -> (i32, i32) {
    %c0_i32 = arith.constant 0 : i32
    %c0_i32_0 = arith.constant 0 : i32
    %c0_i32_1 = arith.constant 0 : i32
    return %c0_i32, %c0_i32_0 : i32, i32
  }
  func.func @transform_2(%arg0: i32) -> (i32, i32) {
    %c0_i32 = arith.constant 0 : i32
    %c0_i32_0 = arith.constant 0 : i32
    %c0_i32_1 = arith.constant 0 : i32
    return %c0_i32, %c0_i32_0 : i32, i32
  }
  func.func @transform_3(%arg0: i32) -> (i32, i32) {
    %c0_i32 = arith.constant 0 : i32
    %c0_i32_0 = arith.constant 0 : i32
    %c0_i32_1 = arith.constant 0 : i32
    return %c0_i32, %c0_i32_0 : i32, i32
  }
  func.func @transform_4(%arg0: i32) -> (i32, i32) {
    %c0_i32 = arith.constant 0 : i32
    %c0_i32_0 = arith.constant 0 : i32
    %c0_i32_1 = arith.constant 0 : i32
    return %c0_i32, %c0_i32_0 : i32, i32
  }
  func.func @transform_5(%arg0: i32) -> (i32, i32) {
    %c0_i32 = arith.constant 0 : i32
    %c0_i32_0 = arith.constant 0 : i32
    return %c0_i32, %arg0 : i32, i32
  }
}

</mosaic_0001>

<bundles_post_ra>
// kernel: tpu_custom_call.1
= control target key start
LH: loop header
LB: loop body
LE: loop exit
PB: predicated region body
PF: predicated region fallthrough
CT: control target
= control target key end

     0   :  { %vm76_vm0 = vcmask 23552   ;;  %v837_v8 = vmov 0   ;;  %s959_s0 = inlined_call_operand.vmem [shape: f32[8,3], index: 0, kind: input, shape index: {}]   ;;  %s960_s1 = inlined_call_operand.vmem [shape: f32[32,3], index: 1, kind: input, shape index: {}]   ;;  %s961_s2 = inlined_call_operand.vmem [shape: f32[32,1], index: 2, kind: input, shape index: {}]   ;;  %s962_s3 = inlined_call_operand.vmem [shape: f32[32,1], index: 3, kind: input, shape index: {}]   ;;  %s963_s4 = inlined_call_operand.<no memory space> [shape: f32[1,1], index: 4, kind: input, shape index: {}]   ;;  %s964_s5 = inlined_call_operand.hbm [shape: f32[1,8], index: 5, kind: output, shape index: {}]  }
   0x1   :  { %v75_v0 = vld [vmem:[%s959_s0] sm:$0xff]  ;;  %v23_v2 = vld [vmem:[%s960_s1 + $0x8] sm:$0xff]  ;;  %v24_v6 = vld [vmem:[%s960_s1 + $0x10] sm:$0xff]  ;;  %811 = vset.pattern.permute.xlu0 %v837_v8  ;;  %812 = vset.pattern.permute.xlu1 %v837_v8 }
   0x2   :  { %v22_v1 = vld [vmem:[%s960_s1] sm:$0xff]  ;;  %v90_v3 = vsel %vm76_vm0, %v75_v0, 0  ;;  %v81_v5 = vsel %vm76_vm0, %v23_v2, 0  ;;  %v25_v7 = vld [vmem:[%s960_s1 + $0x18] sm:$0xff]  ;;  %v84_v13 = vsel %vm76_vm0, %v24_v6, 0  ;;  %v28_v14 = vld [vmem:[%s961_s2 + $0x10] sm:$0xff] }
   0x3   :  { %v78_v4 = vsel %vm76_vm0, %v22_v1, 0  ;;  %v26_v9 = vld [vmem:[%s961_s2] sm:$0xff]  ;;  %v890_v10 = vand.u32 4294901760, %v90_v3  ;;  %v894_v12 = vand.u32 4294901760, %v81_v5  ;;  %v900_v15 = vand.u32 4294901760, %v84_v13  ;;  %42 = vperm.xlu1 %812, %v28_v14   ;;  %v27_v17 = vld [vmem:[%s961_s2 + $0x8] sm:$0xff] }
   0x4   :  { %v892_v11 = vand.u32 4294901760, %v78_v4  ;;  %32 = vperm.xlu0 %811, %v26_v9   ;;  %v87_v16 = vsel %vm76_vm0, %v25_v7, 0  ;;  %v29_v22 = vld [vmem:[%s961_s2 + $0x18] sm:$0xff] }
   0x5   :  { %761 = vmatprep.subr.mxu0 %v890_v10  ;;  %737 = vmatprep.subr.mxu1 %v890_v10  ;;  %v169_v19 = vsub.f32 %v81_v5, %v894_v12  ;;  %v200_v20 = vsub.f32 %v90_v3, %v890_v10  ;;  %v188_v21 = vand.u32 4294901760, %v87_v16 }
   0x6   :  { %v159_v18 = vsub.f32 %v78_v4, %v892_v11 }
   0x7   :  { %11 = vsyncpa [#allocation4], 0  ;;  %762 = vmatpush3.xpose.msra.mxu0 %v890_v10  ;;  %738 = vmatpush3.xpose.msra.mxu1 %v890_v10  ;;  %v179_v23 = vsub.f32 %v84_v13, %v900_v15  ;;  %v170_v25 = vand.u32 4294901760, %v169_v19  ;;  %v201_v26 = vand.u32 4294901760, %v200_v20  ;;  %v189_v27 = vsub.f32 %v87_v16, %v188_v21  ;;  %v50_v33 = vld [vmem:[%s962_s3] sm:$0xff]  ;;  %v51_v41 = vld [vmem:[%s962_s3 + $0x8] sm:$0xff] }
   0x8   :  { %v160_v24 = vand.u32 4294901760, %v159_v18  ;;  %37 = vperm.xlu0 %811, %v27_v17   ;;  %47 = vperm.xlu1 %812, %v29_v22   ;;  %v52_v42 = vld [vmem:[%s962_s3 + $0x10] sm:$0xff]  ;;  %v53_v43 = vld [vmem:[%s962_s3 + $0x18] sm:$0xff]  ;;  %vm675_vm1 = vcmask 64512   ;;  %s838_s17 = smov [#allocation3]   ;;  %vm691_vm2 = vcmask 57344  }
   0x9   :  { %v180_v28 = vand.u32 4294901760, %v179_v23  ;;  %v202_v30 = vsub.f32 %v200_v20, %v201_v26  ;;  %v171_v31 = vsub.f32 %v169_v19, %v170_v25  ;;  %v190_v32 = vand.u32 4294901760, %v189_v27  ;;  %769 = vmatprep.subr.mxu0 %v201_v26  ;;  %s699_s18 = sshll.u32 %s838_s17, 4  ;;  %s700_s18 = int_to_ptr.vmem [resolvable:$true] %s699_s18 }
   0xa   :  { %763 = vmatprep.mubr.f32.mxu0 %v160_v24  ;;  %v161_v29 = vsub.f32 %v159_v18, %v160_v24  ;;  %v689_v24 = vstv %s963_s4  ;;  %s813_s19 = scalar_lea.vmem %s700_s18, 16  ;;  %s817_s20 = scalar_lea.vmem %s700_s18, 32 }
   0xb   :  { %764 = vmatmul.mubr.f32.vlgmr.msra.gmra.mrb[0].mxu0 %v170_v25  ;;  %v181_v34 = vsub.f32 %v179_v23, %v180_v28  ;;  %v203_v36 = vand.u32 4294901760, %v202_v30  ;;  %v172_v37 = vand.u32 4294901760, %v171_v31  ;;  %v191_v38 = vsub.f32 %v189_v27, %v190_v32  ;;  %p814_p0 = scmp.ne.s32.totalorder %s700_s18, %s813_s19  ;;  %p818_p1 = scmp.lt.s32.totalorder %s700_s18, %s700_s18 }
   0xc   :  { %v162_v35 = vand.u32 4294901760, %v161_v29  ;;  %766 = vmatprep.mubr.f32.mxu0 %v180_v28  ;;  %770 = vmatpush3.xpose.msra.mxu0 %v201_v26  ;;  %p819_p2 = scmp.lt.s32.totalorder %s817_s20, %s813_s19 }
   0xd   :  { %v182_v39 = vand.u32 4294901760, %v181_v34  ;;  %777 = vmatprep.subr.mxu0 %v890_v10  ;;  %56 = vperm.xlu0 %811, %v50_v33   ;;  %v192_v40 = vand.u32 4294901760, %v191_v38 }
   0xe   :  { %739 = vmatprep.mubr.f32.mxu1 %v162_v35  ;;  %745 = vmatprep.subr.mxu1 %v203_v36  ;;  %p820_p3 = por %p819_p2, %p818_p1 }
   0xf   :  { %740 = vmatmul.mubr.f32.vlgmr.msra.gmra.mrb[0].mxu1 %v172_v37  ;;  %767 = vmatmul.mubr.f32.gmra.mrb[2].mxu0 %v190_v32 }
  0x10   :  { %746 = vmatpush3.xpose.msra.mxu1 %v203_v36  ;;  %742 = vmatprep.mubr.f32.mxu1 %v182_v39  ;;  %p821_p4 = pnand %p820_p3, %p814_p0 }
  0x11   :  { %771 = vmatprep.mubr.f32.mxu0 %v892_v11  ;;  %753 = vmatprep.subr.mxu1 %v200_v20 }
  0x12   :  { %61 = vperm.xlu1 %812, %v51_v41   ;;  %66 = vperm.xlu0 %811, %v52_v42  }
  0x13   :  { %743 = vmatmul.mubr.f32.gmra.mrb[2].mxu1 %v192_v40  ;;  %772 = vmatmul.mubr.f32.vlgmr.msra.gmra.mrb[0].mxu0 %v894_v12 }
  0x14   :  { %747 = vmatprep.mubr.f32.mxu1 %v892_v11  ;;  %774 = vmatprep.mubr.f32.mxu0 %v900_v15 }
  0x15   :  { %778 = vmatpush3.xpose.msra.mxu0 %v890_v10 }
  0x16   :  { %71 = vperm.xlu1 %812, %v53_v43  }
  0x17   :  { %748 = vmatmul.mubr.f32.vlgmr.msra.gmra.mrb[0].mxu1 %v894_v12  ;;  %775 = vmatmul.mubr.f32.gmra.mrb[2].mxu0 %v188_v21 }
  0x18   :  { %754 = vmatpush3.xpose.msra.mxu1 %v200_v20  ;;  %750 = vmatprep.mubr.f32.mxu1 %v900_v15 }
  0x19   :  { %779 = vmatprep.mubr.f32.mxu0 %v892_v11 }
  0x1b   :  { %751 = vmatmul.mubr.f32.gmra.mrb[2].mxu1 %v188_v21  ;;  %780 = vmatmul.mubr.f32.vlgmr.msra.gmra.mrb[0].mxu0 %v894_v12 }
  0x1c   :  { %755 = vmatprep.mubr.f32.mxu1 %v159_v18  ;;  %782 = vmatprep.mubr.f32.mxu0 %v900_v15 }
  0x1f   :  { %756 = vmatmul.mubr.f32.vlgmr.msra.gmra.mrb[0].mxu1 %v169_v19  ;;  %783 = vmatmul.mubr.f32.gmra.mrb[2].mxu0 %v188_v21 }
  0x20   :  { %758 = vmatprep.mubr.f32.mxu1 %v179_v23 }
  0x23   :  { %759 = vmatmul.mubr.f32.gmra.mrb[2].mxu1 %v189_v27 }
  0x82   :  { %v43_v45 = vpop.permute.xlu1 %42 }
  0x83   :  { %v33_v44 = vpop.permute.xlu0 %32 }
  0x87   :  { %v38_v48 = vpop.permute.xlu0 %37  ;;  %v48_v49 = vpop.permute.xlu1 %47 }
  0x8c   :  { %v57_v57 = vpop.permute.xlu0 %56 }
  0x91   :  { %v62_v60 = vpop.permute.xlu1 %61  ;;  %v67_v10 = vpop.permute.xlu0 %66 }
  0x95   :  { %v72_v11 = vpop.permute.xlu1 %71 }
  0xee   :  { %v781_v46 = vpop.f32.mrb[0].mxu0 }
  0xef   :  { %v645_v47 = vpop.f32.mrb[1].mxu0 }
  0xf2   :  { %v757_v50 = vpop.f32.mrb[0].mxu1  ;;  %v784_v51 = vpop.f32.mrb[2].mxu0 }
  0xf3   :  { %v785_v52 = vadd.f32 %v757_v50, %v38_v48  ;;  %v362_v53 = vpop.f32.mrb[1].mxu1  ;;  %v657_v54 = vpop.f32.mrb[3].mxu0 }
  0xf4   :  { %v787_v55 = vadd.f32 %v362_v53, %v33_v44 }
  0xf5   :  { %v786_v56 = vadd.f32 %v785_v52, %v781_v46 }
  0xf6   :  { %v788_v58 = vadd.f32 %v787_v55, %v645_v47  ;;  %v760_v59 = vpop.f32.mrb[2].mxu1 }
  0xf7   :  { %v668_v61 = vmax.f32 %v786_v56, 0.0  ;;  %v789_v62 = vadd.f32 %v760_v59, %v48_v49  ;;  %v376_v63 = vpop.f32.mrb[3].mxu1 }
  0xf8   :  { %v667_v0 = vmax.f32 %v788_v58, 0.0  ;;  %v791_v1 = vadd.f32 %v376_v63, %v43_v45 }
  0xf9   :  { %v672_v2 = vmul.f32 %v668_v61, %v62_v60  ;;  %v790_v3 = vadd.f32 %v789_v62, %v784_v51 }
  0xfa   :  { %v671_v4 = vmul.f32 %v667_v0, %v57_v57  ;;  %v792_v5 = vadd.f32 %v791_v1, %v657_v54 }
  0xfb   :  { %v677_v6 = vsel %vm675_vm1, %v672_v2, 0.0  ;;  %v670_v7 = vmax.f32 %v790_v3, 0.0 }
  0xfc   :  { %v676_v8 = vsel %vm675_vm1, %v671_v4, 0.0  ;;  %v669_v9 = vmax.f32 %v792_v5, 0.0 }
  0xfd   :  { %v678_v12 = vadd.f32 %v677_v6, %v676_v8  ;;  %v674_v13 = vmul.f32 %v670_v7, %v72_v11 }
  0xfe   :  { %v673_v14 = vmul.f32 %v669_v9, %v67_v10 }
  0xff   :  { %v681_v17 = vsel %vm675_vm1, %v674_v13, 0.0 }
 0x100   :  { %v679_v15 = vsel %vm675_vm1, %v673_v14, 0.0 }
 0x101   :  { %v680_v16 = vadd.f32 %v679_v15, %v678_v12 }
 0x103   :  { %v682_v18 = vadd.f32 %v681_v17, %v680_v16 }
 0x105   :  { %v683_v19 = vrot.slane %v682_v18, 4 }
 0x107   :  { %v684_v20 = vadd.f32 %v683_v19, %v682_v18 }
 0x109   :  { %v685_v21 = vrot.slane %v684_v20, 2 }
 0x10b   :  { %v686_v22 = vadd.f32 %v685_v21, %v684_v20 }
 0x10d   :  { %v687_v23 = vrot.slane %v686_v22, 1 }
 0x10f   :  { %v688_v25 = vadd.f32 %v687_v23, %v686_v22 }
 0x111   :  { %v690_v26 = vadd.f32 %v689_v24, %v688_v25 }
 0x113   :  { %692 = vst.msk [vmem:[#allocation3] sm:$0x1] %vm691_vm2, %v690_v26 }
 0x114   :  { %824 = shalt.err (!%p821_p4)
}
 0x115   :  { %s825_s23 = scalar_lea.hbm %s964_s5, 16 }
 0x116   :  { %p826_p5 = scmp.ne.s32.totalorder %s964_s5, %s825_s23  ;;  %p829_p6 = scmp.lt.u32.totalorder %s825_s23, %s964_s5 }
 0x118   :  { %p831_p7 = pnand %p829_p6, %p826_p5 }
 0x11a   :  { %834 = shalt.err (!%p831_p7)
}
 0x11b   :  { %702 = dma.vmem_to_hbm [thread:$0]  %s700_s18, 16, %s964_s5, [#allocation4]  }
 0x11c   :  { %835 = dma.done.wait [#allocation4], 16  }
 0x11d   :  { %836 = vsyncadd [#allocation4], 4294967280 }
 0x11e   :  { %706 = vsyncpa [#allocation4], 1 }

</bundles_post_ra>
